<compile_context>
chip_gen: v7x
topology: tpu7x:2x2x1
jax: 0.10.0
libtpu: 0.0.40
codegen_flags: <defaults>
</compile_context>

<pallas_src>
import functools

import jax
import jax.numpy as jnp
from jax.experimental import pallas as pl
from jax.experimental.pallas import tpu as pltpu


def _round_up(a, m):
    return (a + m - 1) // m * m


def _pick_tile_rows(n, tile_rows, sub):
    """Choose the ROI-tile height.

    Prefers MXU-aligned tiles (multiples of 256 when the batch is large enough,
    otherwise the dtype sublane packing `sub`) and tries to produce >= 2 grid
    steps so both TensorCores get work on dual-TC parts (v7x)."""
    if n >= 2 * tile_rows:
        return tile_rows
    align = 256 if n >= 512 else sub
    tn = _round_up(max(pl.cdiv(n, 2), 1), align)
    if tn >= n:                       # can't usefully split -> one full tile
        tn = _round_up(max(n, 1), sub)
    return tn


def _predictor_kernel(*refs, apply_mask, inv_keep, k_cls_pad):
    """Fused dropout-mask apply + combined cls/bbox Linear.

    refs (apply_mask=True):  x (TN,C), mask (TN,C) int8, w (C,KT), b (1,KT) f32,
                             scores (TN,KC), bbox (TN,KB)
    refs (apply_mask=False): x (TN,C),                   w (C,KT), b (1,KT) f32,
                             scores (TN,KC), bbox (TN,KB)
    """
    if apply_mask:
        x_ref, mask_ref, w_ref, b_ref, scores_ref, bbox_ref = refs
    else:
        x_ref, w_ref, b_ref, scores_ref, bbox_ref = refs

    x = x_ref[...]
    if apply_mask:
        # int8 keep-mask; the 1/(1-p) scale is applied to the f32 accumulator
        # below (it commutes with the Linear), so the mask apply is a pure select.
        x = jnp.where(mask_ref[...] != 0, x, jnp.zeros_like(x))

    # Single lane-dense MXU pass over both heads; f32 accumulation.
    acc = jnp.dot(x, w_ref[...], preferred_element_type=jnp.float32)
    if apply_mask:
        acc = acc * inv_keep
    acc = acc + b_ref[...]

    # k_cls_pad is a multiple of 128 -> both stores are lane-dense, unmasked.
    scores_ref[...] = acc[:, :k_cls_pad].astype(scores_ref.dtype)
    bbox_ref[...] = acc[:, k_cls_pad:].astype(bbox_ref.dtype)


def custom_fast_rcnn_predictor(x, params, *, dropout_p, training=False, rng_key=None,
                               compute_dtype=jnp.bfloat16, tile_rows=512):
    """JAX/Pallas equivalent of CustomFastRCNNPredictor.forward.

    x            : (N, C) or (N, C, 1, 1) ROI-pooled features.
    params       : dict with 'w_cls' (C, K), 'b_cls' (K,), 'w_bbox' (C, 4K),
                   'b_bbox' (4K,)  (weights stored transposed w.r.t. PyTorch).
    compute_dtype: MXU operand dtype. bfloat16 by default on every TPU generation
                   (v7x MXU has no fast f32 path); accumulation is always f32.
                   Pass jnp.float32 for full-precision operands.
    returns      : (scores (N, K) f32, bbox_deltas (N, 4K) f32)
    """
    if x.ndim == 4:
        assert tuple(x.shape[2:]) == (1, 1), (
            f"x has the wrong shape, expecting the last two dimensions to be "
            f"[1,1] instead of {list(x.shape[2:])}")
    x2d = x.reshape(x.shape[0], -1)                 # flatten(start_dim=1)
    n, c = x2d.shape

    cdt = jnp.dtype(compute_dtype) if compute_dtype is not None else jnp.dtype(x2d.dtype)

    k_cls = params["w_cls"].shape[1]
    k_bbox = params["w_bbox"].shape[1]
    # Zero-pad each head's width to a multiple of 128 so both output tiles (and
    # the fused MXU N dimension) are lane-dense; pads are sliced off below.
    k_cls_pad = _round_up(k_cls, 128)
    k_bbox_pad = _round_up(k_bbox, 128)
    k_tot = k_cls_pad + k_bbox_pad

    # Fuse + pad + cast the weights ONCE in the wrapper (no per-grid-step casts
    # inside the kernel; bf16 weights also halve the resident VMEM footprint).
    w_all = jnp.zeros((c, k_tot), dtype=cdt)
    w_all = w_all.at[:, :k_cls].set(params["w_cls"].astype(cdt))
    w_all = w_all.at[:, k_cls_pad:k_cls_pad + k_bbox].set(params["w_bbox"].astype(cdt))
    b_all = jnp.zeros((1, k_tot), dtype=jnp.float32)   # bias stays f32 (added to f32 acc)
    b_all = b_all.at[0, :k_cls].set(params["b_cls"].reshape(-1).astype(jnp.float32))
    b_all = b_all.at[0, k_cls_pad:k_cls_pad + k_bbox].set(
        params["b_bbox"].reshape(-1).astype(jnp.float32))

    x_in = x2d.astype(cdt)

    apply_mask = bool(training) and float(dropout_p) > 0.0
    inv_keep = 1.0 / (1.0 - float(dropout_p)) if apply_mask else 1.0
    inputs = [x_in]
    if apply_mask:
        # TODO(synk): generate the keep-mask on-chip (pltpu.prng_seed/prng_random_bits)
        # once the stateful PRNG is available on all paths we run; meanwhile the int8
        # mask keeps the extra HBM stream at 1 byte/element.
        if rng_key is None:
            raise ValueError("training=True with dropout_p > 0 requires rng_key")
        keep = jax.random.bernoulli(rng_key, 1.0 - float(dropout_p), (n, c))
        inputs.append(keep.astype(jnp.int8))
    inputs += [w_all, b_all]

    sub = 16 if cdt == jnp.dtype(jnp.bfloat16) else 8
    tn = _pick_tile_rows(n, int(tile_rows), sub)
    grid = (pl.cdiv(n, tn),)

    in_specs = [pl.BlockSpec((tn, c), lambda i: (i, 0))]              # x tile
    if apply_mask:
        in_specs.append(pl.BlockSpec((tn, c), lambda i: (i, 0)))      # int8 mask tile
    in_specs += [
        # Constant index_map -> weight/bias stay VMEM-resident; single buffer
        # (no useless second pipeline copy of the (C, 5K) slab).
        pl.BlockSpec((c, k_tot), lambda i: (0, 0), pipeline_mode=pl.Buffered(1)),
        pl.BlockSpec((1, k_tot), lambda i: (0, 0), pipeline_mode=pl.Buffered(1)),
    ]
    out_specs = (
        pl.BlockSpec((tn, k_cls_pad), lambda i: (i, 0)),
        pl.BlockSpec((tn, k_bbox_pad), lambda i: (i, 0)),
    )
    out_shape = (
        jax.ShapeDtypeStruct((n, k_cls_pad), jnp.float32),
        jax.ShapeDtypeStruct((n, k_bbox_pad), jnp.float32),
    )

    # Explicit VMEM budget (matters on v7x: 64 MiB physical / 32 MiB scoped default).
    csize = cdt.itemsize
    vmem_est = (2 * tn * c * csize                      # x (double-buffered)
                + (2 * tn * c if apply_mask else 0)     # int8 mask (double-buffered)
                + c * k_tot * csize + k_tot * 4         # resident weight + bias
                + 2 * tn * k_tot * 4)                   # two f32 output tiles (double-buffered)
    vmem_limit = int(min(max(2 * vmem_est, 16 * 1024 * 1024), 64 * 1024 * 1024))

    cost = pl.CostEstimate(
        flops=2 * n * c * k_tot,
        transcendentals=0,
        bytes_accessed=(n * c * csize + (n * c if apply_mask else 0)
                        + c * k_tot * csize + k_tot * 4 + n * k_tot * 4),
    )

    kernel = functools.partial(_predictor_kernel, apply_mask=apply_mask,
                               inv_keep=inv_keep, k_cls_pad=k_cls_pad)

    scores_pad, bbox_pad = pl.pallas_call(
        kernel,
        grid=grid,
        in_specs=in_specs,
        out_specs=out_specs,
        out_shape=out_shape,
        compiler_params=pltpu.CompilerParams(
            dimension_semantics=("parallel",),
            vmem_limit_bytes=vmem_limit),
        cost_estimate=cost,
    )(*inputs)

    # Slice the zero-pad columns off (no-op when the head width is lane-aligned).
    scores = scores_pad if k_cls == k_cls_pad else scores_pad[:, :k_cls]
    bbox_deltas = bbox_pad if k_bbox == k_bbox_pad else bbox_pad[:, :k_bbox]
    return scores, bbox_deltas


def init_params(key, in_channels, num_classes, dtype=jnp.float32):
    """nn.Linear-style init: U(-1/sqrt(fan_in), 1/sqrt(fan_in)).

    Weights are stored as (in_channels, out_features), i.e. transposed relative
    to PyTorch's (out_features, in_channels).
    """
    k1, k2, k3, k4 = jax.random.split(key, 4)
    bound = 1.0 / (in_channels ** 0.5)
    w_cls = jax.random.uniform(k1, (in_channels, num_classes),
                               minval=-bound, maxval=bound, dtype=dtype)
    b_cls = jax.random.uniform(k2, (num_classes,),
                               minval=-bound, maxval=bound, dtype=dtype)
    w_bbox = jax.random.uniform(k3, (in_channels, num_classes * 4),
                                minval=-bound, maxval=bound, dtype=dtype)
    b_bbox = jax.random.uniform(k4, (num_classes * 4,),
                                minval=-bound, maxval=bound, dtype=dtype)
    return {"w_cls": w_cls, "b_cls": b_cls, "w_bbox": w_bbox, "b_bbox": b_bbox}


if __name__ == "__main__":
    # Small synthetic shapes consistent with the module: ROI features (N, C, 1, 1).
    batch = 8
    in_channels = 32
    num_classes = 5
    dropout_p = 0.5

    key = jax.random.PRNGKey(0)
    kx, kp, kd = jax.random.split(key, 3)
    x = jax.random.normal(kx, (batch, in_channels, 1, 1), dtype=jnp.float32)
    params = init_params(kp, in_channels, num_classes)
    x2d = x.reshape(batch, -1)
    hp = jax.lax.Precision.HIGHEST

    ref_scores = jnp.dot(x2d, params["w_cls"], precision=hp) + params["b_cls"]
    ref_bbox = jnp.dot(x2d, params["w_bbox"], precision=hp) + params["b_bbox"]

    # ---- Eval mode, f32 MXU operands: strict reference check ----
    scores, bbox_deltas = custom_fast_rcnn_predictor(
        x, params, dropout_p=dropout_p, training=False, compute_dtype=jnp.float32)
    jax.block_until_ready((scores, bbox_deltas))
    assert scores.shape == (batch, num_classes)
    assert bbox_deltas.shape == (batch, num_classes * 4)
    assert jnp.allclose(scores, ref_scores, atol=1e-2, rtol=1e-2)
    assert jnp.allclose(bbox_deltas, ref_bbox, atol=1e-2, rtol=1e-2)

    # ---- Eval mode, default bf16 MXU operands (f32 accumulation): loose check ----
    bf_scores, bf_bbox = custom_fast_rcnn_predictor(
        x, params, dropout_p=dropout_p, training=False)
    jax.block_until_ready((bf_scores, bf_bbox))
    assert jnp.allclose(bf_scores, ref_scores, atol=5e-2, rtol=5e-2)
    assert jnp.allclose(bf_bbox, ref_bbox, atol=5e-2, rtol=5e-2)

    # ---- Training mode (int8 keep-mask streamed, 1/(1-p) folded in-kernel) ----
    keep = jax.random.bernoulli(kd, 1.0 - dropout_p, x2d.shape)
    x_drop = x2d * keep.astype(x2d.dtype) / (1.0 - dropout_p)
    ref_tr_scores = jnp.dot(x_drop, params["w_cls"], precision=hp) + params["b_cls"]
    ref_tr_bbox = jnp.dot(x_drop, params["w_bbox"], precision=hp) + params["b_bbox"]

    tr_scores, tr_bbox = custom_fast_rcnn_predictor(
        x, params, dropout_p=dropout_p, training=True, rng_key=kd,
        compute_dtype=jnp.float32)
    jax.block_until_ready((tr_scores, tr_bbox))
    assert jnp.allclose(tr_scores, ref_tr_scores, atol=1e-2, rtol=1e-2)
    assert jnp.allclose(tr_bbox, ref_tr_bbox, atol=1e-2, rtol=1e-2)

    tr_scores_bf, tr_bbox_bf = custom_fast_rcnn_predictor(
        x, params, dropout_p=dropout_p, training=True, rng_key=kd)
    jax.block_until_ready((tr_scores_bf, tr_bbox_bf))
    assert jnp.allclose(tr_scores_bf, ref_tr_scores, atol=1e-1, rtol=1e-1)
    assert jnp.allclose(tr_bbox_bf, ref_tr_bbox, atol=1e-1, rtol=1e-1)

    print("KERNEL_OK")
</pallas_src>

<mosaic_0001>
module attributes {stable_mosaic.version = 11 : i64} {
  func.func @_predictor_kernel(%arg0: i32, %arg1: memref<8x32xf32, #tpu.memory_space<vmem>>, %arg2: memref<32x256xf32, #tpu.memory_space<vmem>>, %arg3: memref<1x256xf32, #tpu.memory_space<vmem>>, %arg4: memref<8x128xf32, #tpu.memory_space<vmem>>, %arg5: memref<8x128xf32, #tpu.memory_space<vmem>>) attributes {dimension_semantics = [#tpu.dimension_semantics<parallel>], iteration_bounds = array<i64: 1>, scalar_prefetch = 0 : i64, scratch_operands = 0 : i64, tpu.core_type = #tpu.core_type<tc>, window_params = [{transform_indices = @transform_0, window_bounds = array<i64: 8, 32>}, {pipeline_mode = #tpu.pipeline_mode<synchronous>, transform_indices = @transform_1, window_bounds = array<i64: 32, 256>}, {pipeline_mode = #tpu.pipeline_mode<synchronous>, transform_indices = @transform_2, window_bounds = array<i64: 1, 256>}, {transform_indices = @transform_3, window_bounds = array<i64: 8, 128>}, {transform_indices = @transform_4, window_bounds = array<i64: 8, 128>}]} {
    %c0 = arith.constant 0 : index
    %c0_0 = arith.constant 0 : index
    %0 = vector.load %arg1[%c0, %c0_0] : memref<8x32xf32, #tpu.memory_space<vmem>>, vector<8x32xf32>
    %c0_1 = arith.constant 0 : index
    %c0_2 = arith.constant 0 : index
    %1 = vector.load %arg2[%c0_1, %c0_2] : memref<32x256xf32, #tpu.memory_space<vmem>>, vector<32x256xf32>
    %cst = arith.constant dense<0.000000e+00> : vector<8x256xf32>
    %2 = tpu.matmul %0, %1, %cst {dimension_numbers = #tpu.dot_dimension_numbers<[1], [0], [0], [1], [0, 0, 1, 1], [], []>} : vector<8x32xf32>, vector<32x256xf32>, vector<8x256xf32> -> vector<8x256xf32>
    %c0_3 = arith.constant 0 : index
    %c0_4 = arith.constant 0 : index
    %3 = vector.load %arg3[%c0_3, %c0_4] : memref<1x256xf32, #tpu.memory_space<vmem>>, vector<1x256xf32>
    %4 = vector.broadcast %3 : vector<1x256xf32> to vector<8x256xf32>
    %5 = arith.addf %2, %4 : vector<8x256xf32>
    %6 = vector.extract_strided_slice %5 {offsets = [0, 0], sizes = [8, 128], strides = [1, 1]} : vector<8x256xf32> to vector<8x128xf32>
    %c0_5 = arith.constant 0 : index
    %c0_6 = arith.constant 0 : index
    %7 = vector.load %arg4[%c0_5, %c0_6] : memref<8x128xf32, #tpu.memory_space<vmem>>, vector<8x128xf32>
    tpu.vector_store %arg4[%c0_5, %c0_6], %6 {strides = array<i32>} : memref<8x128xf32, #tpu.memory_space<vmem>>, vector<8x128xf32>,
    %8 = vector.extract_strided_slice %5 {offsets = [0, 128], sizes = [8, 128], strides = [1, 1]} : vector<8x256xf32> to vector<8x128xf32>
    %c0_7 = arith.constant 0 : index
    %c0_8 = arith.constant 0 : index
    %9 = vector.load %arg5[%c0_7, %c0_8] : memref<8x128xf32, #tpu.memory_space<vmem>>, vector<8x128xf32>
    tpu.vector_store %arg5[%c0_7, %c0_8], %8 {strides = array<i32>} : memref<8x128xf32, #tpu.memory_space<vmem>>, vector<8x128xf32>,
    return
  }
  func.func @transform_0(%arg0: i32) -> (i32, i32) {
    %c0_i32 = arith.constant 0 : i32
    %c0_i32_0 = arith.constant 0 : i32
    return %arg0, %c0_i32 : i32, i32
  }
  func.func @transform_1(%arg0: i32) -> (i32, i32) {
    %c0_i32 = arith.constant 0 : i32
    %c0_i32_0 = arith.constant 0 : i32
    %c0_i32_1 = arith.constant 0 : i32
    return %c0_i32, %c0_i32_0 : i32, i32
  }
  func.func @transform_2(%arg0: i32) -> (i32, i32) {
    %c0_i32 = arith.constant 0 : i32
    %c0_i32_0 = arith.constant 0 : i32
    %c0_i32_1 = arith.constant 0 : i32
    return %c0_i32, %c0_i32_0 : i32, i32
  }
  func.func @transform_3(%arg0: i32) -> (i32, i32) {
    %c0_i32 = arith.constant 0 : i32
    %c0_i32_0 = arith.constant 0 : i32
    return %arg0, %c0_i32 : i32, i32
  }
  func.func @transform_4(%arg0: i32) -> (i32, i32) {
    %c0_i32 = arith.constant 0 : i32
    %c0_i32_0 = arith.constant 0 : i32
    return %arg0, %c0_i32 : i32, i32
  }
}

</mosaic_0001>

<bundles_post_ra>
// kernel: tpu_custom_call.1
= control target key start
LH: loop header
LB: loop body
LE: loop exit
PB: predicated region body
PF: predicated region fallthrough
CT: control target
= control target key end

     0   :  { %10 = vsyncpa [#allocation3], 0  ;;  %s374_s0 = inlined_call_operand.hbm [shape: f32[8,32], index: 0, kind: input, shape index: {}]   ;;  %s375_s1 = inlined_call_operand.hbm [shape: f32[32,256], index: 1, kind: input, shape index: {}]   ;;  %s376_s2 = inlined_call_operand.vmem [shape: f32[1,256], index: 2, kind: input, shape index: {}]   ;;  %s377_s3 = inlined_call_operand.hbm [shape: f32[8,128], index: 3, kind: output, shape index: {0}]   ;;  %s378_s4 = inlined_call_operand.hbm [shape: f32[8,128], index: 4, kind: output, shape index: {1}]  }
   0x1   :  { %11 = vsyncpa [#allocation6], 0 }
   0x2   :  { %12 = vsyncpa [#allocation4], 0 }
   0x3   :  { %13 = vsyncpa [#allocation9], 0  ;;  %s284_s15 = smov [#allocation2]   ;;  %s285_s17 = smov [#allocation5]  }
   0x4   :  { %s20_s16 = sshll.u32 %s284_s15, 4  ;;  %s29_s18 = sshll.u32 %s285_s17, 4  ;;  %s21_s16 = int_to_ptr.vmem [resolvable:$true] %s20_s16  ;;  %s316_s18 = int_to_ptr.vmem [resolvable:$true] %s29_s18 }
   0x5   :  { %s188_s21 = scalar_lea.hbm %s374_s0, 128 }
   0x6   :  { %p189_p0 = scmp.ne.s32.totalorder %s374_s0, %s188_s21  ;;  %p192_p1 = scmp.lt.u32.totalorder %s188_s21, %s374_s0 }
   0x8   :  { %p194_p2 = pnand %p192_p1, %p189_p0 }
   0xa   :  { %197 = shalt.err (!%p194_p2)
}
   0xb   :  { %s198_s26 = scalar_lea.vmem %s21_s16, 128  ;;  %p203_p4 = scmp.lt.s32.totalorder %s21_s16, %s21_s16 }
   0xc   :  { %p199_p3 = scmp.ne.s32.totalorder %s21_s16, %s198_s26  ;;  %p204_p5 = scmp.lt.s32.totalorder %s198_s26, %s198_s26 }
   0xe   :  { %p205_p6 = por %p204_p5, %p203_p4 }
  0x10   :  { %p206_p7 = pnand %p205_p6, %p199_p3 }
  0x12   :  { %209 = shalt.err (!%p206_p7)
}
  0x13   :  { %23 = dma.hbm_to_vmem [thread:$0]  %s374_s0, 128, %s21_s16, [#allocation3]  }
  0x14   :  { %s210_s5 = scalar_lea.hbm %s375_s1, 1024 }
  0x15   :  { %p211_p8 = scmp.ne.s32.totalorder %s375_s1, %s210_s5  ;;  %p214_p9 = scmp.lt.u32.totalorder %s210_s5, %s375_s1 }
  0x17   :  { %p216_p10 = pnand %p214_p9, %p211_p8 }
  0x19   :  { %219 = shalt.err (!%p216_p10)
}
  0x1a   :  { %s220_s10 = scalar_lea.vmem %s316_s18, 1024  ;;  %p225_p12 = scmp.lt.s32.totalorder %s316_s18, %s316_s18 }
  0x1b   :  { %p221_p11 = scmp.ne.s32.totalorder %s316_s18, %s220_s10  ;;  %p226_p13 = scmp.lt.s32.totalorder %s220_s10, %s220_s10 }
  0x1d   :  { %p227_p0 = por %p226_p13, %p225_p12 }
  0x1f   :  { %p228_p1 = pnand %p227_p0, %p221_p11 }
  0x21   :  { %231 = shalt.err (!%p228_p1)
}
  0x22   :  { %s286_s0 = smov 256   ;;  %s287_s11 = smov 16  }
  0x23   :  { %35 = dma.hbm_to_vmem [thread:$0]  %s375_s1, 1024, %s316_s18, [#allocation6], %s286_s0, %s286_s0, %s287_s11  }
  0x24   :  { %276 = dma.done.wait [#allocation3], 128  }
  0x25   :  { %277 = vsyncadd [#allocation3], 4294967168 }
  0x26   :  { %278 = dma.done.wait [#allocation6], 1024  }
  0x27   :  { %279 = vsyncadd [#allocation6], 4294966272  ;;  %v288_v0 = vmov 0.0   ;;  %v46_v1 = vld [vmem:[#allocation5 + $0x8] sm:$0xff]  ;;  %v48_v2 = vld [vmem:[#allocation5 + $0x18] sm:$0xff]  ;;  %vm65_vm0 = vcmask 261120   ;;  %v55_v14 = vlaneseq }
  0x28   :  { %133 = vmatprep.mubr.f32.mxu0 %v288_v0  ;;  %v45_v3 = vld [vmem:[#allocation5] sm:$0xff]  ;;  %v173_v4 = vpack.c.bf16 %v48_v2, %v46_v1  ;;  %v47_v5 = vld [vmem:[#allocation5 + $0x10] sm:$0xff]  ;;  %v50_v6 = vld [vmem:[#allocation5 + $0x28] sm:$0xff]  ;;  %s289_s15 = smov [#allocation7]   ;;  %s290_s17 = smov [#allocation8]  }
  0x29   :  { %v52_v7 = vld [vmem:[#allocation5 + $0x38] sm:$0xff]  ;;  %v175_v8 = vpack.c.bf16 %v47_v5, %v45_v3  ;;  %v49_v10 = vld [vmem:[#allocation5 + $0x20] sm:$0xff]  ;;  %v51_v11 = vld [vmem:[#allocation5 + $0x30] sm:$0xff]  ;;  %v56_v15 = vshrl.u32 %v55_v14, 7  ;;  %s148_s16 = sshll.u32 %s289_s15, 4  ;;  %s158_s18 = sshll.u32 %s290_s17, 4  ;;  %s149_s16 = int_to_ptr.vmem [resolvable:$true] %s148_s16  ;;  %s159_s18 = int_to_ptr.vmem [resolvable:$true] %s158_s18 }
  0x2a   :  { %v177_v9 = vpack.c.bf16 %v52_v7, %v50_v6  ;;  %174 = vmatprep.subr.bf16.mxu0 %v173_v4  ;;  %v179_v12 = vpack.c.bf16 %v51_v11, %v49_v10  ;;  %v44_v13 = vld [vmem:[#allocation2] sm:$0xff]  ;;  %s232_s19 = scalar_lea.vmem %s149_s16, 128  ;;  %p237_p3 = scmp.lt.s32.totalorder %s149_s16, %s149_s16 }
  0x2b   :  { %176 = vmatpush1.bf16.msra.mxu0 %v175_v8  ;;  %v57_v16 = vsub.s32 0, %v56_v15  ;;  %v53_v17 = vld [vmem:[%s376_s2] sm:$0x3]  ;;  %v61_v18 = vsub.s32 1, %v56_v15  ;;  %p233_p2 = scmp.ne.s32.totalorder %s149_s16, %s232_s19  ;;  %p238_p4 = scmp.lt.s32.totalorder %s232_s19, %s232_s19 }
  0x2c   :  { %178 = vmatprep.subr.bf16.mxu0 %v177_v9 }
  0x2d   :  { %v58_v19 = vrot.slane %v53_v17, %v57_v16  ;;  %v62_v20 = vrot.slane %v53_v17, %v61_v18  ;;  %p239_p5 = por %p238_p4, %p237_p3 }
  0x2f   :  { %180 = vmatpush1.bf16.msra.mxu0 %v179_v12  ;;  %p240_p6 = pnand %p239_p5, %p233_p2 }
  0x32   :  { %172 = vmatmul.mubr.msk.f32.vlgmr.msra.gmra.mrb[0].mxu0 %vm65_vm0, %v44_v13 }
 0x105   :  { %v135_v21 = vpop.f32.mrb[0].mxu0 }
 0x106   :  { %v136_v22 = vadd.f32 %v135_v21, %v58_v19  ;;  %v137_v23 = vpop.f32.mrb[1].mxu0 }
 0x107   :  { %v138_v24 = vadd.f32 %v137_v23, %v62_v20 }
 0x108   :  { %140 = vst [vmem:[#allocation7] sm:$0xff] %v136_v22 }
 0x109   :  { %141 = vst [vmem:[#allocation8] sm:$0xff] %v138_v24 }
 0x10a   :  { %243 = shalt.err (!%p240_p6)
}
 0x10b   :  { %s244_s21 = scalar_lea.hbm %s377_s3, 128 }
 0x10c   :  { %p245_p7 = scmp.ne.s32.totalorder %s377_s3, %s244_s21  ;;  %p248_p8 = scmp.lt.u32.totalorder %s244_s21, %s377_s3 }
 0x10e   :  { %p250_p9 = pnand %p248_p8, %p245_p7 }
 0x110   :  { %253 = shalt.err (!%p250_p9)
}
 0x111   :  { %151 = dma.vmem_to_hbm [thread:$0]  %s149_s16, 128, %s377_s3, [#allocation4]  }
 0x112   :  { %s254_s28 = scalar_lea.vmem %s159_s18, 128  ;;  %p259_p11 = scmp.lt.s32.totalorder %s159_s18, %s159_s18 }
 0x113   :  { %p255_p10 = scmp.ne.s32.totalorder %s159_s18, %s254_s28  ;;  %p260_p12 = scmp.lt.s32.totalorder %s254_s28, %s254_s28 }
 0x115   :  { %p261_p13 = por %p260_p12, %p259_p11 }
 0x117   :  { %p262_p0 = pnand %p261_p13, %p255_p10 }
 0x119   :  { %265 = shalt.err (!%p262_p0)
}
 0x11a   :  { %s266_s5 = scalar_lea.hbm %s378_s4, 128 }
 0x11b   :  { %p267_p1 = scmp.ne.s32.totalorder %s378_s4, %s266_s5  ;;  %p270_p2 = scmp.lt.u32.totalorder %s266_s5, %s378_s4 }
 0x11d   :  { %p272_p3 = pnand %p270_p2, %p267_p1 }
 0x11f   :  { %275 = shalt.err (!%p272_p3)
}
 0x120   :  { %161 = dma.vmem_to_hbm [thread:$0]  %s159_s18, 128, %s378_s4, [#allocation9]  }
 0x121   :  { %280 = dma.done.wait [#allocation4], 128  }
 0x122   :  { %281 = vsyncadd [#allocation4], 4294967168 }
 0x123   :  { %282 = dma.done.wait [#allocation9], 128  }
 0x124   :  { %283 = vsyncadd [#allocation9], 4294967168 }
 0x125   :  { %168 = vsyncpa [#allocation3], 1 }
 0x126   :  { %169 = vsyncpa [#allocation6], 1 }
 0x127   :  { %170 = vsyncpa [#allocation4], 1 }
 0x128   :  { %171 = vsyncpa [#allocation9], 1 }

</bundles_post_ra>
